<compile_context>
chip_gen: v7x
topology: tpu7x:2x2x1
jax: 0.10.0
libtpu: 0.0.40
codegen_flags: <defaults>
</compile_context>

<pallas_src>
import math
import functools

import numpy as np
import jax
import jax.numpy as jnp
from jax import lax
from jax.experimental import pallas as pl
from jax.experimental.pallas import tpu as pltpu


# ----------------------- pass 1: K/V projection + RoPE(K) -----------------------
def kv_project_kernel(x_ref, wan_ref, wkv_ref, cosk_ref, sink_ref, k_ref, v_ref,
                      *, n_kv_heads, head_dim, eps):
    hh = head_dim // 2
    kv_dim = n_kv_heads * head_dim
    kv_half = n_kv_heads * hh

    x = x_ref[0].astype(jnp.float32)                          # (tS, D)
    inv = lax.rsqrt(jnp.mean(x * x, axis=-1, keepdims=True) + eps)
    xn = ((x * inv) * wan_ref[...]).astype(jnp.bfloat16)
    kv = jnp.dot(xn, wkv_ref[...], preferred_element_type=jnp.float32)   # (tS, 2*KVD)

    xk = kv[:, :kv_dim]                                       # global-halves layout
    xv = kv[:, kv_dim:]                                       # original layout
    k1 = xk[:, :kv_half]                                      # even rotary comps
    k2 = xk[:, kv_half:]                                      # odd rotary comps
    ck = cosk_ref[...]                                        # (tS, KVD/2) head-packed
    sk = sink_ref[...]
    k1r = k1 * ck - k2 * sk
    k2r = k1 * sk + k2 * ck
    # repack once per position: per kv-head [even-rot | odd-rot] blocks of width head_dim
    parts = []
    for g in range(n_kv_heads):
        parts.append(k1r[:, g * hh:(g + 1) * hh])
        parts.append(k2r[:, g * hh:(g + 1) * hh])
    k_ref[0] = jnp.concatenate(parts, axis=-1).astype(jnp.bfloat16)      # (tS, KVD)
    v_ref[0] = xv.astype(jnp.bfloat16)                                   # (tS, KVD)


# --------------- pass 2: Q + RoPE + grouped attention + wo + FFN ----------------
def attn_ffn_kernel(x_ref, wan_ref, wq_ref, wo_ref, cosq_ref, sinq_ref,
                    k_ref, v_ref, wfn_ref, w13_ref, w2_ref, o_ref,
                    *, n_heads, n_kv_heads, head_dim, hidden_dim, eps):
    hh = head_dim // 2
    n_rep = n_heads // n_kv_heads
    tS = x_ref.shape[1]
    Dh = n_heads * hh                                         # = D // 2

    # ----- RMSNorm + Q projection (wq columns pre-permuted to global-halves) -----
    x = x_ref[0].astype(jnp.float32)                          # (tS, D)
    inv = lax.rsqrt(jnp.mean(x * x, axis=-1, keepdims=True) + eps)
    xn = ((x * inv) * wan_ref[...]).astype(jnp.bfloat16)
    xq = jnp.dot(xn, wq_ref[...], preferred_element_type=jnp.float32)    # (tS, D)

    # ----- RoPE (tables are precomputed, head-packed, with 1/sqrt(hd) folded in) -----
    cq = cosq_ref[...]                                        # (tS, D/2)
    sq = sinq_ref[...]
    q1 = xq[:, :Dh]
    q2 = xq[:, Dh:]
    q1r = q1 * cq - q2 * sq
    q2r = q1 * sq + q2 * cq

    k_all = k_ref[0]                                          # (S, KVD) bf16
    v_all = v_ref[0]                                          # (S, KVD) bf16

    # ----- grouped attention: one score / one P@V matmul per kv head -----
    # NOTE: no causal mask — mirrors the PyTorch module (full attention, start_pos=0).
    dn = (((1,), (1,)), ((), ()))                             # contract last dims (q . k)
    ctx_parts = [None] * n_heads
    for g in range(n_kv_heads):
        heads = range(g * n_rep, (g + 1) * n_rep)
        # stack the group's query heads along M (head-major rows: row = r*tS + t)
        qe = jnp.concatenate([q1r[:, h * hh:(h + 1) * hh] for h in heads], axis=0)
        qo = jnp.concatenate([q2r[:, h * hh:(h + 1) * hh] for h in heads], axis=0)
        qg = jnp.concatenate([qe, qo], axis=-1).astype(jnp.bfloat16)     # (n_rep*tS, hd)
        kg = k_all[:, g * head_dim:(g + 1) * head_dim]                   # (S, hd)
        s = lax.dot_general(qg, kg, dn, preferred_element_type=jnp.float32)  # (n_rep*tS, S)
        s = s - jnp.max(s, axis=-1, keepdims=True)
        e = jnp.exp(s)
        p = e * pl.reciprocal(jnp.sum(e, axis=-1, keepdims=True), approx=True)
        vg = v_all[:, g * head_dim:(g + 1) * head_dim]                   # (S, hd)
        cg = jnp.dot(p.astype(jnp.bfloat16), vg,
                     preferred_element_type=jnp.float32)                 # (n_rep*tS, hd)
        for r in range(n_rep):
            ctx_parts[g * n_rep + r] = cg[r * tS:(r + 1) * tS, :]
    ctx = jnp.concatenate(ctx_parts, axis=-1).astype(jnp.bfloat16)       # (tS, D)
    attn = jnp.dot(ctx, wo_ref[...], preferred_element_type=jnp.float32)

    h = x + attn

    # ----- FFN RMSNorm + SwiGLU (fused w1|w3) -----
    inv2 = lax.rsqrt(jnp.mean(h * h, axis=-1, keepdims=True) + eps)
    hn = ((h * inv2) * wfn_ref[...]).astype(jnp.bfloat16)
    gu = jnp.dot(hn, w13_ref[...], preferred_element_type=jnp.float32)   # (tS, 2H)
    gg = gu[:, :hidden_dim]
    uu = gu[:, hidden_dim:]
    act = (gg * jax.nn.sigmoid(gg) * uu).astype(jnp.bfloat16)            # SiLU(g) * u
    ff = jnp.dot(act, w2_ref[...], preferred_element_type=jnp.float32)   # (tS, D)

    o_ref[0] = (h + ff).astype(o_ref.dtype)


# ------------------------------ one-time parameter prep ------------------------------
def prepare_params(params, *, n_heads, n_kv_heads):
    """Rotary-halves column permutation of wq/wk, K|V and w1|w3 fusion, bf16 cast."""
    D = params["wq_t"].shape[0]
    hd = D // n_heads
    hh = hd // 2

    def rotary_perm(nh):
        d = nh * hd
        perm = np.zeros(d, dtype=np.int32)
        for h in range(nh):
            for j in range(hh):
                perm[h * hh + j] = h * hd + 2 * j               # even rotary comps
                perm[d // 2 + h * hh + j] = h * hd + 2 * j + 1  # odd rotary comps
        return jnp.asarray(perm)

    wq_p = params["wq_t"][:, rotary_perm(n_heads)].astype(jnp.bfloat16)
    wk_p = params["wk_t"][:, rotary_perm(n_kv_heads)]
    wkv = jnp.concatenate([wk_p, params["wv_t"]], axis=1).astype(jnp.bfloat16)
    w13 = jnp.concatenate([params["w1_t"], params["w3_t"]], axis=1).astype(jnp.bfloat16)
    return {
        "w_attn_norm": params["w_attn_norm"].astype(jnp.float32)[None, :],
        "w_ffn_norm": params["w_ffn_norm"].astype(jnp.float32)[None, :],
        "wq": wq_p,                    # (D, D)   global-halves column layout
        "wkv": wkv,                    # (D, 2*KVD)  [K global-halves | V original]
        "wo": params["wo_t"].astype(jnp.bfloat16),
        "w13": w13,                    # (D, 2H)
        "w2": params["w2_t"].astype(jnp.bfloat16),
    }


def prepare_rope(cos_base, sin_base, *, n_heads, n_kv_heads, head_dim):
    """Full-width head-packed RoPE tables; attention scale folded into the Q tables."""
    scale = 1.0 / math.sqrt(head_dim)
    c = cos_base.astype(jnp.float32)       # (S, head_dim//2)
    s = sin_base.astype(jnp.float32)
    return {
        "cos_q": jnp.concatenate([c] * n_heads, axis=-1) * scale,      # (S, D/2)
        "sin_q": jnp.concatenate([s] * n_heads, axis=-1) * scale,
        "cos_k": jnp.concatenate([c] * n_kv_heads, axis=-1),           # (S, KVD/2)
        "sin_k": jnp.concatenate([s] * n_kv_heads, axis=-1),
    }


def _vmem_limit_bytes():
    # ~96 MiB on v5e/v6e (128 MiB physical), clamped to 3/4 of capacity on v7x.
    try:
        cap = int(pltpu.get_tpu_info().vmem_capacity_bytes)
    except Exception:
        cap = 128 * 1024 * 1024
    return min(100 * 1024 * 1024, (cap * 3) // 4)


# ------------------------------------ wrapper ------------------------------------
def encoder_block(x, prep, rope, *, n_heads, n_kv_heads, eps, start_pos=0, seq_tile=None):
    assert start_pos == 0  # TODO(synk): KV-cache prefix for start_pos > 0
    B, S, D = x.shape
    hd = D // n_heads
    kv_dim = n_kv_heads * hd
    hidden = prep["w2"].shape[0]

    # Production: use 256 (v5e) / 256-512 (v6e) tiles, multiples of 128.
    tS = seq_tile if seq_tile is not None else min(S, 256)
    assert S % tS == 0 and tS % 8 == 0
    nq = S // tS

    x_bf = x.astype(jnp.bfloat16)          # halve x HBM traffic / resident VMEM
    vmem = _vmem_limit_bytes()

    # ----- pass 1: K/V for the whole sequence -----
    kv_kernel = functools.partial(kv_project_kernel,
                                  n_kv_heads=n_kv_heads, head_dim=hd, eps=eps)
    k_rot, v_all = pl.pallas_call(
        kv_kernel,
        out_shape=(jax.ShapeDtypeStruct((B, S, kv_dim), jnp.bfloat16),
                   jax.ShapeDtypeStruct((B, S, kv_dim), jnp.bfloat16)),
        grid_spec=pltpu.PrefetchScalarGridSpec(
            num_scalar_prefetch=0,
            grid=(B, nq),
            in_specs=[
                pl.BlockSpec((1, tS, D), lambda b, s: (b, s, 0)),
                pl.BlockSpec(prep["w_attn_norm"].shape, lambda b, s: (0, 0)),
                pl.BlockSpec(prep["wkv"].shape, lambda b, s: (0, 0)),
                pl.BlockSpec((tS, kv_dim // 2), lambda b, s: (s, 0)),
                pl.BlockSpec((tS, kv_dim // 2), lambda b, s: (s, 0)),
            ],
            out_specs=(pl.BlockSpec((1, tS, kv_dim), lambda b, s: (b, s, 0)),
                       pl.BlockSpec((1, tS, kv_dim), lambda b, s: (b, s, 0))),
        ),
        compiler_params=pltpu.CompilerParams(
            dimension_semantics=("parallel", "parallel"),
            vmem_limit_bytes=vmem),
    )(x_bf, prep["w_attn_norm"], prep["wkv"], rope["cos_k"], rope["sin_k"])

    # ----- pass 2: attention + FFN over (batch, query-tile) -----
    main_kernel = functools.partial(attn_ffn_kernel,
                                    n_heads=n_heads, n_kv_heads=n_kv_heads,
                                    head_dim=hd, hidden_dim=hidden, eps=eps)
    in_specs = [
        pl.BlockSpec((1, tS, D), lambda b, q: (b, q, 0)),              # x tile
        pl.BlockSpec(prep["w_attn_norm"].shape, lambda b, q: (0, 0)),
        pl.BlockSpec(prep["wq"].shape, lambda b, q: (0, 0)),
        pl.BlockSpec(prep["wo"].shape, lambda b, q: (0, 0)),
        pl.BlockSpec((tS, D // 2), lambda b, q: (q, 0)),               # cos_q tile
        pl.BlockSpec((tS, D // 2), lambda b, q: (q, 0)),               # sin_q tile
        pl.BlockSpec((1, S, kv_dim), lambda b, q: (b, 0, 0)),          # K (per batch)
        pl.BlockSpec((1, S, kv_dim), lambda b, q: (b, 0, 0)),          # V (per batch)
        pl.BlockSpec(prep["w_ffn_norm"].shape, lambda b, q: (0, 0)),
        pl.BlockSpec(prep["w13"].shape, lambda b, q: (0, 0)),
        pl.BlockSpec(prep["w2"].shape, lambda b, q: (0, 0)),
    ]
    return pl.pallas_call(
        main_kernel,
        out_shape=jax.ShapeDtypeStruct((B, S, D), x.dtype),
        grid_spec=pltpu.PrefetchScalarGridSpec(
            num_scalar_prefetch=0,
            grid=(B, nq),
            in_specs=in_specs,
            out_specs=pl.BlockSpec((1, tS, D), lambda b, q: (b, q, 0)),
        ),
        compiler_params=pltpu.CompilerParams(
            dimension_semantics=("parallel", "parallel"),
            vmem_limit_bytes=vmem),
    )(x_bf, prep["w_attn_norm"], prep["wq"], prep["wo"],
      rope["cos_q"], rope["sin_q"], k_rot, v_all,
      prep["w_ffn_norm"], prep["w13"], prep["w2"])


# ---------------------------- pure-JAX reference ----------------------------
def _rms_ref(x, w, eps):
    return w * (x * lax.rsqrt(jnp.mean(x * x, axis=-1, keepdims=True) + eps))


def _rope_ref(x, cos, sin):
    a = x[..., 0::2]
    b = x[..., 1::2]
    c = cos[None, :, None, :]
    s = sin[None, :, None, :]
    o1 = a * c - b * s
    o2 = a * s + b * c
    return jnp.stack([o1, o2], axis=-1).reshape(x.shape)


def encoder_ref(x, p, cos, sin, n_heads, n_kv_heads, eps):
    B, S, D = x.shape
    hd = D // n_heads
    n_rep = n_heads // n_kv_heads
    xn = _rms_ref(x, p["w_attn_norm"], eps)
    xq = (xn @ p["wq_t"]).reshape(B, S, n_heads, hd)
    xk = (xn @ p["wk_t"]).reshape(B, S, n_kv_heads, hd)
    xv = (xn @ p["wv_t"]).reshape(B, S, n_kv_heads, hd)
    xq = _rope_ref(xq, cos, sin)
    xk = _rope_ref(xk, cos, sin)
    keys = jnp.repeat(xk, n_rep, axis=2)
    vals = jnp.repeat(xv, n_rep, axis=2)
    q = xq.transpose(0, 2, 1, 3)
    k = keys.transpose(0, 2, 1, 3)
    v = vals.transpose(0, 2, 1, 3)
    s = jnp.einsum("bhqd,bhkd->bhqk", q, k) / math.sqrt(hd)
    pr = jax.nn.softmax(s, axis=-1)
    o = jnp.einsum("bhqk,bhkd->bhqd", pr, v).transpose(0, 2, 1, 3).reshape(B, S, D)
    h = x + o @ p["wo_t"]
    hn = _rms_ref(h, p["w_ffn_norm"], eps)
    g = hn @ p["w1_t"]
    u = hn @ p["w3_t"]
    return h + (jax.nn.silu(g) * u) @ p["w2_t"]


if __name__ == "__main__":
    B, S = 2, 32
    DIM, N_HEADS, N_KV_HEADS = 128, 4, 2
    MULTIPLE_OF = 128
    EPS = 1e-5
    HEAD_DIM = DIM // N_HEADS          # 32
    SEQ_TILE = 16                      # multi-tile grid; >=16 for bf16 sublane packing

    hidden = 4 * DIM
    hidden = int(2 * hidden / 3)
    hidden = MULTIPLE_OF * ((hidden + MULTIPLE_OF - 1) // MULTIPLE_OF)   # 384

    key = jax.random.PRNGKey(0)
    ks = jax.random.split(key, 8)

    def init(k, shape, fan_in):
        return jax.random.normal(k, shape, jnp.float32) / math.sqrt(fan_in)

    params = {
        "w_attn_norm": jnp.ones((DIM,), jnp.float32),
        "w_ffn_norm": jnp.ones((DIM,), jnp.float32),
        "wq_t": init(ks[0], (DIM, DIM), DIM),
        "wk_t": init(ks[1], (DIM, N_KV_HEADS * HEAD_DIM), DIM),
        "wv_t": init(ks[2], (DIM, N_KV_HEADS * HEAD_DIM), DIM),
        "wo_t": init(ks[3], (DIM, DIM), DIM),
        "w1_t": init(ks[4], (DIM, hidden), DIM),
        "w3_t": init(ks[5], (DIM, hidden), DIM),
        "w2_t": init(ks[6], (hidden, DIM), hidden),
    }
    x = jax.random.normal(ks[7], (B, S, DIM), jnp.float32)

    # rotary frequencies for positions [0, S)
    j = jnp.arange(HEAD_DIM // 2, dtype=jnp.float32)
    theta = 10000.0 ** (-2.0 * j / HEAD_DIM)
    t = jnp.arange(S, dtype=jnp.float32)
    ang = t[:, None] * theta[None, :]                      # (S, head_dim//2)
    cos_base, sin_base = jnp.cos(ang), jnp.sin(ang)

    prep = prepare_params(params, n_heads=N_HEADS, n_kv_heads=N_KV_HEADS)     # once
    rope = prepare_rope(cos_base, sin_base, n_heads=N_HEADS,
                        n_kv_heads=N_KV_HEADS, head_dim=HEAD_DIM)             # once

    out = encoder_block(x, prep, rope, n_heads=N_HEADS, n_kv_heads=N_KV_HEADS,
                        eps=EPS, start_pos=0, seq_tile=SEQ_TILE)
    out = jax.block_until_ready(out)

    ref = encoder_ref(x, params, cos_base, sin_base, N_HEADS, N_KV_HEADS, EPS)
    # Tolerance reflects bf16 MXU operands / bf16 x vs an all-f32 reference.
    np.testing.assert_allclose(np.asarray(out), np.asarray(ref), rtol=1e-1, atol=1e-1)
    print("KERNEL_OK")
</pallas_src>

<mosaic_0001>
module attributes {stable_mosaic.version = 11 : i64} {
  func.func @kv_project_kernel(%arg0: i32, %arg1: i32, %arg2: memref<1x16x128xbf16, #tpu.memory_space<vmem>>, %arg3: memref<1x128xf32, #tpu.memory_space<vmem>>, %arg4: memref<128x128xbf16, #tpu.memory_space<vmem>>, %arg5: memref<16x32xf32, #tpu.memory_space<vmem>>, %arg6: memref<16x32xf32, #tpu.memory_space<vmem>>, %arg7: memref<1x16x64xbf16, #tpu.memory_space<vmem>>, %arg8: memref<1x16x64xbf16, #tpu.memory_space<vmem>>) attributes {dimension_semantics = [#tpu.dimension_semantics<parallel>, #tpu.dimension_semantics<parallel>], iteration_bounds = array<i64: 2, 2>, scalar_prefetch = 0 : i64, scratch_operands = 0 : i64, tpu.core_type = #tpu.core_type<tc>, window_params = [{transform_indices = @transform_0, window_bounds = array<i64: 1, 16, 128>}, {pipeline_mode = #tpu.pipeline_mode<synchronous>, transform_indices = @transform_1, window_bounds = array<i64: 1, 128>}, {pipeline_mode = #tpu.pipeline_mode<synchronous>, transform_indices = @transform_2, window_bounds = array<i64: 128, 128>}, {transform_indices = @transform_3, window_bounds = array<i64: 16, 32>}, {transform_indices = @transform_4, window_bounds = array<i64: 16, 32>}, {transform_indices = @transform_5, window_bounds = array<i64: 1, 16, 64>}, {transform_indices = @transform_6, window_bounds = array<i64: 1, 16, 64>}]} {
    %c0 = arith.constant 0 : index
    %c0_0 = arith.constant 0 : index
    %c0_1 = arith.constant 0 : index
    %0 = vector.load %arg2[%c0, %c0_0, %c0_1] : memref<1x16x128xbf16, #tpu.memory_space<vmem>>, vector<1x16x128xbf16>
    %1 = vector.shape_cast %0 : vector<1x16x128xbf16> to vector<16x128xbf16>
    %2 = arith.extf %1 : vector<16x128xbf16> to vector<16x128xf32>
    %3 = arith.mulf %2, %2 : vector<16x128xf32>
    %cst = arith.constant dense<0.000000e+00> : vector<16xf32>
    %4 = vector.multi_reduction <add>, %3, %cst [1] : vector<16x128xf32> to vector<16xf32>
    %5 = vector.shape_cast %4 : vector<16xf32> to vector<16x1xf32>
    %cst_2 = arith.constant 1.280000e+02 : f32
    %6 = vector.broadcast %cst_2 : f32 to vector<16x1xf32>
    %7 = arith.divf %5, %6 : vector<16x1xf32>
    %cst_3 = arith.constant 9.99999974E-6 : f32
    %8 = vector.broadcast %cst_3 : f32 to vector<16x1xf32>
    %9 = arith.addf %7, %8 : vector<16x1xf32>
    %10 = math.rsqrt %9 : vector<16x1xf32>
    %11 = vector.broadcast %10 : vector<16x1xf32> to vector<16x128xf32>
    %12 = arith.mulf %2, %11 : vector<16x128xf32>
    %c0_4 = arith.constant 0 : index
    %c0_5 = arith.constant 0 : index
    %13 = vector.load %arg3[%c0_4, %c0_5] : memref<1x128xf32, #tpu.memory_space<vmem>>, vector<1x128xf32>
    %14 = vector.broadcast %13 : vector<1x128xf32> to vector<16x128xf32>
    %15 = arith.mulf %12, %14 : vector<16x128xf32>
    %16 = arith.truncf %15 : vector<16x128xf32> to vector<16x128xbf16>
    %c0_6 = arith.constant 0 : index
    %c0_7 = arith.constant 0 : index
    %17 = vector.load %arg4[%c0_6, %c0_7] : memref<128x128xbf16, #tpu.memory_space<vmem>>, vector<128x128xbf16>
    %cst_8 = arith.constant dense<0.000000e+00> : vector<16x128xf32>
    %18 = tpu.matmul %16, %17, %cst_8 {dimension_numbers = #tpu.dot_dimension_numbers<[1], [0], [0], [1], [0, 0, 1, 1], [], []>} : vector<16x128xbf16>, vector<128x128xbf16>, vector<16x128xf32> -> vector<16x128xf32>
    %19 = vector.extract_strided_slice %18 {offsets = [0, 0], sizes = [16, 64], strides = [1, 1]} : vector<16x128xf32> to vector<16x64xf32>
    %20 = vector.extract_strided_slice %18 {offsets = [0, 64], sizes = [16, 64], strides = [1, 1]} : vector<16x128xf32> to vector<16x64xf32>
    %21 = vector.extract_strided_slice %19 {offsets = [0, 0], sizes = [16, 32], strides = [1, 1]} : vector<16x64xf32> to vector<16x32xf32>
    %22 = vector.extract_strided_slice %19 {offsets = [0, 32], sizes = [16, 32], strides = [1, 1]} : vector<16x64xf32> to vector<16x32xf32>
    %c0_9 = arith.constant 0 : index
    %c0_10 = arith.constant 0 : index
    %23 = vector.load %arg5[%c0_9, %c0_10] : memref<16x32xf32, #tpu.memory_space<vmem>>, vector<16x32xf32>
    %c0_11 = arith.constant 0 : index
    %c0_12 = arith.constant 0 : index
    %24 = vector.load %arg6[%c0_11, %c0_12] : memref<16x32xf32, #tpu.memory_space<vmem>>, vector<16x32xf32>
    %25 = arith.mulf %21, %23 : vector<16x32xf32>
    %26 = arith.mulf %22, %24 : vector<16x32xf32>
    %27 = arith.subf %25, %26 : vector<16x32xf32>
    %28 = arith.mulf %21, %24 : vector<16x32xf32>
    %29 = arith.mulf %22, %23 : vector<16x32xf32>
    %30 = arith.addf %28, %29 : vector<16x32xf32>
    %31 = vector.extract_strided_slice %27 {offsets = [0, 0], sizes = [16, 16], strides = [1, 1]} : vector<16x32xf32> to vector<16x16xf32>
    %32 = vector.extract_strided_slice %30 {offsets = [0, 0], sizes = [16, 16], strides = [1, 1]} : vector<16x32xf32> to vector<16x16xf32>
    %33 = vector.extract_strided_slice %27 {offsets = [0, 16], sizes = [16, 16], strides = [1, 1]} : vector<16x32xf32> to vector<16x16xf32>
    %34 = vector.extract_strided_slice %30 {offsets = [0, 16], sizes = [16, 16], strides = [1, 1]} : vector<16x32xf32> to vector<16x16xf32>
    %35 = tpu.concatenate %31, %32, %33, %34 in 1 : vector<16x16xf32>, vector<16x16xf32>, vector<16x16xf32>, vector<16x16xf32> -> vector<16x64xf32>
    %36 = arith.truncf %35 : vector<16x64xf32> to vector<16x64xbf16>
    %c0_13 = arith.constant 0 : index
    %c0_14 = arith.constant 0 : index
    %c0_15 = arith.constant 0 : index
    %37 = vector.load %arg7[%c0_13, %c0_14, %c0_15] : memref<1x16x64xbf16, #tpu.memory_space<vmem>>, vector<1x16x64xbf16>
    %38 = vector.shape_cast %37 : vector<1x16x64xbf16> to vector<16x64xbf16>
    %39 = vector.shape_cast %36 : vector<16x64xbf16> to vector<1x16x64xbf16>
    tpu.vector_store %arg7[%c0_13, %c0_14, %c0_15], %39 {strides = array<i32>} : memref<1x16x64xbf16, #tpu.memory_space<vmem>>, vector<1x16x64xbf16>,
    %40 = arith.truncf %20 : vector<16x64xf32> to vector<16x64xbf16>
    %c0_16 = arith.constant 0 : index
    %c0_17 = arith.constant 0 : index
    %c0_18 = arith.constant 0 : index
    %41 = vector.load %arg8[%c0_16, %c0_17, %c0_18] : memref<1x16x64xbf16, #tpu.memory_space<vmem>>, vector<1x16x64xbf16>
    %42 = vector.shape_cast %41 : vector<1x16x64xbf16> to vector<16x64xbf16>
    %43 = vector.shape_cast %40 : vector<16x64xbf16> to vector<1x16x64xbf16>
    tpu.vector_store %arg8[%c0_16, %c0_17, %c0_18], %43 {strides = array<i32>} : memref<1x16x64xbf16, #tpu.memory_space<vmem>>, vector<1x16x64xbf16>,
    return
  }
  func.func @transform_0(%arg0: i32, %arg1: i32) -> (i32, i32, i32) {
    %c0_i32 = arith.constant 0 : i32
    %c0_i32_0 = arith.constant 0 : i32
    return %arg0, %arg1, %c0_i32 : i32, i32, i32
  }
  func.func @transform_1(%arg0: i32, %arg1: i32) -> (i32, i32) {
    %c0_i32 = arith.constant 0 : i32
    %c0_i32_0 = arith.constant 0 : i32
    %c0_i32_1 = arith.constant 0 : i32
    return %c0_i32, %c0_i32_0 : i32, i32
  }
  func.func @transform_2(%arg0: i32, %arg1: i32) -> (i32, i32) {
    %c0_i32 = arith.constant 0 : i32
    %c0_i32_0 = arith.constant 0 : i32
    %c0_i32_1 = arith.constant 0 : i32
    return %c0_i32, %c0_i32_0 : i32, i32
  }
  func.func @transform_3(%arg0: i32, %arg1: i32) -> (i32, i32) {
    %c0_i32 = arith.constant 0 : i32
    %c0_i32_0 = arith.constant 0 : i32
    return %arg1, %c0_i32 : i32, i32
  }
  func.func @transform_4(%arg0: i32, %arg1: i32) -> (i32, i32) {
    %c0_i32 = arith.constant 0 : i32
    %c0_i32_0 = arith.constant 0 : i32
    return %arg1, %c0_i32 : i32, i32
  }
  func.func @transform_5(%arg0: i32, %arg1: i32) -> (i32, i32, i32) {
    %c0_i32 = arith.constant 0 : i32
    %c0_i32_0 = arith.constant 0 : i32
    return %arg0, %arg1, %c0_i32 : i32, i32, i32
  }
  func.func @transform_6(%arg0: i32, %arg1: i32) -> (i32, i32, i32) {
    %c0_i32 = arith.constant 0 : i32
    %c0_i32_0 = arith.constant 0 : i32
    return %arg0, %arg1, %c0_i32 : i32, i32, i32
  }
}

</mosaic_0001>

<bundles_post_ra>
// kernel: tpu_custom_call.1
= control target key start
LH: loop header
LB: loop body
LE: loop exit
PB: predicated region body
PF: predicated region fallthrough
CT: control target
= control target key end

     0   :  { %s1994_s0 = inlined_call_operand.hbm [shape: bf16[2,32,128], index: 0, kind: input, shape index: {}]   ;;  %s1995_s1 = inlined_call_operand.hbm [shape: f32[1,128], index: 1, kind: input, shape index: {}]   ;;  %s1996_s2 = inlined_call_operand.hbm [shape: bf16[128,128], index: 2, kind: input, shape index: {}]   ;;  %s1997_s3 = inlined_call_operand.hbm [shape: f32[32,32], index: 3, kind: input, shape index: {}]   ;;  %s1998_s4 = inlined_call_operand.hbm [shape: f32[32,32], index: 4, kind: input, shape index: {}]   ;;  %s1999_s5 = inlined_call_operand.hbm [shape: bf16[2,32,64], index: 5, kind: output, shape index: {0}]   ;;  %s2000_s6 = inlined_call_operand.hbm [shape: bf16[2,32,64], index: 6, kind: output, shape index: {1}]  }
   0x1   :  { %2030 = sst [smem:[#allocation30_spill]] %s1994_s0 }
   0x2   :  { %2031 = sst [smem:[#allocation31_spill]] %s1995_s1 }
   0x3   :  { %2032 = sst [smem:[#allocation32_spill]] %s1996_s2 }
   0x4   :  { %2033 = sst [smem:[#allocation33_spill]] %s1997_s3 }
   0x5   :  { %2034 = sst [smem:[#allocation34_spill]] %s1999_s5 }
   0x6   :  { %2035 = sst [smem:[#allocation35_spill]] %s2000_s6 }
   0x7   :  { %12 = vsyncpa [#allocation3], 0 }
   0x8   :  { %14 = vsyncpa [#allocation3 + $0x1], 0 }
   0x9   :  { %15 = vsyncpa [#allocation6], 0 }
   0xa   :  { %16 = vsyncpa [#allocation9], 0 }
   0xb   :  { %18 = vsyncpa [#allocation9 + $0x1], 0 }
   0xc   :  { %19 = vsyncpa [#allocation4], 0 }
   0xd   :  { %21 = vsyncpa [#allocation4 + $0x1], 0 }
   0xe   :  { %22 = vsyncpa [#allocation13], 0 }
   0xf   :  { %24 = vsyncpa [#allocation13 + $0x1], 0  ;;  %s1500_s21 = smov 0   ;;  %s1502_s22 = smov 0  }
  0x10   :  { %s1504_s23 = smov 0   ;;  %s1506_s24 = smov 0  }
  0x11   :  { %s1508_s25 = smov 0   ;;  %s1510_s26 = smov 0  }
  0x12   :  { %s1512_s27 = smov 0   ;;  %s1514_s28 = smov 0  }
  0x13   :  { %s1516_s29 = smov 0   ;;  %s1518_s30 = smov 0  }
  0x14   :  { %s1520_s7 = smov 0  }
  0x15 LB: > { %2036 = sst [smem:[#allocation19_spill]] %s1409_s22  ;;  %s1554_s8 = sadd.s32 4294967295, %s1445_s7   ;;  %s1445_s7 = sphi %s1520_s7, %s30_s7   ;;  %s1441_s30 = sphi %s1518_s30, %s2104_s30   ;;  %s1437_s29 = sphi %s1516_s29, %s2103_s29   ;;  %s1433_s28 = sphi %s1514_s28, %s2102_s28   ;;  %s1429_s27 = sphi %s1512_s27, %s2101_s27   ;;  %s1425_s26 = sphi %s1510_s26, %s2100_s26   ;;  %s1421_s25 = sphi %s1508_s25, %s2099_s25   ;;  %s1417_s24 = sphi %s1506_s24, %s2098_s24   ;;  %s1413_s23 = sphi %s1504_s23, %s2096_s23   ;;  %s1409_s22 = sphi %s1502_s22, %s2095_s22   ;;  %s1405_s21 = sphi %s1500_s21, %s2094_s21  }
  0x16   : > { %2037 = sst [smem:[#allocation20_spill]] %s1413_s23  ;;  %s876_s9 = sadd.s32 4294967294, %s1445_s7  }
  0x17   : > { %2038 = sst [smem:[#allocation21_spill]] %s1417_s24  ;;  %p64_p0 = scmp.ne.s32.totalorder %s1421_s25, %s1417_s24 }
  0x18   : > { %2039 = sst [smem:[#allocation22_spill]] %s1429_s27  ;;  %p2004_p1 = scmp.eq.s32.totalorder %s1554_s8, 0 }
  0x19   : > { %2040 = sst [smem:[#allocation23_spill]] %s1433_s28  ;;  %p132_p2 = scmp.ne.s32.totalorder %s1409_s22, %s1405_s21 }
  0x1a   : > { %p1563_p3 = por %p2004_p1, %p64_p0  ;;  %p190_p4 = scmp.eq.s32.totalorder %s876_s9, 3 }
  0x1b   : > { %p1569_p5 = por %p132_p2, %p2004_p1  ;;  %p877_p6 = scmp.ge.s32.totalorder %s1445_s7, 1 }
  0x1c   : > { %s2041_s10 = scalar_select %p1563_p3, 1, 0 }
  0x1d   : > { %s2043_s11 = scalar_select %p1569_p5, 1, 0 }
  0x1e   : > { %2042 = sst [smem:[#allocation24_spill]] %s2041_s10  ;;  %p1574_p7 = por %p190_p4, %p64_p0 }
  0x1f   : > { %2044 = sst [smem:[#allocation25_spill]] %s2043_s11  ;;  %p225_p8 = scmp.lt.s32.totalorder %s1445_s7, 5 }
  0x20   : > { %s2045_s12 = scalar_select %p1574_p7, 1, 0 }
  0x21   : > { %p1579_p9 = pnand %p877_p6, %p225_p8  ;;  %s1447_s14 = smov [#allocation5]  }
  0x22   : > { %2046 = sst [smem:[#allocation26_spill]] %s2045_s12  ;;  %s238_s15 = sshll.u32 %s1447_s14, 4  ;;  %s239_s15 = int_to_ptr.vmem [resolvable:$true] %s238_s15 }
  0x23   : > { %s2047_s13 = scalar_select %p1579_p9, 1, 0 }
  0x24   : > { %p979_p10 = pneg %p1579_p9  ;;  %s39_s17 = sadd.s32 1, %s1437_s29 }
  0x25   : > { %2048 = sst [smem:[#allocation27_spill]] %s2047_s13  ;;  %p1593_p13 = scmp.ge.s32.totalorder %s39_s17, 2 }
  0x26   : > { %p1587_p11 = pnand %p979_p10, %p2004_p1  ;;  %s2051_s1 = sld [smem:[#allocation31_spill]] }
  0x27   : > { %s2050_s18 = scalar_select %p1593_p13, 1, 0 }
  0x28   : > { %p2014_p2 = pneg %p1587_p11 }
  0x2c   : > { %s1137_s21 = scalar_lea.hbm %s2051_s1, 16 }
  0x2d   : > { %p1138_p0 = scmp.ne.s32.totalorder %s2051_s1, %s1137_s21  ;;  %p1144_p8 = scmp.lt.u32.totalorder %s1137_s21, %s2051_s1 }
  0x2f   : > { %p1140_p4 = pnand %p2014_p2, %p1138_p0 }
  0x31   : > { %p1141_p6 = pneg %p1140_p4 }
  0x33   : > { %p1146_p10 = pnand %p1144_p8, %p1141_p6 }
  0x35   : > { %1149 = shalt.err (!%p1146_p10)
}
  0x36   : > { %s1150_s5 = scalar_lea.vmem %s239_s15, 16  ;;  %s1157_s19 = scalar_lea.vmem %s239_s15, 32 }
  0x37   : > { %p1151_p1 = scmp.ne.s32.totalorder %s239_s15, %s1150_s5  ;;  %p1158_p5 = scmp.lt.s32.totalorder %s239_s15, %s239_s15 }
  0x38   : > { %p1159_p3 = scmp.lt.s32.totalorder %s1157_s19, %s1150_s5 }
  0x39   : > { %p1153_p12 = pnand %p1151_p1, %p2014_p2 }
  0x3a   : > { %p1160_p9 = por %p1159_p3, %p1158_p5 }
  0x3b   : > { %p1154_p7 = pneg %p1153_p12 }
  0x3d   : > { %p1161_p13 = pnand %p1160_p9, %p1154_p7 }
  0x3f   : > { %1164 = shalt.err (!%p1161_p13)
}
  0x40   : > { %982 = dma.hbm_to_vmem [thread:$0]  (!%p1587_p11), %s2051_s1, 16, %s239_s15, [#allocation6]  }
  0x41   : > { %p2052_p1 = scmp.ne.s32.totalorder %s2050_s18, 0  ;;  %s119_s5 = sadd.s32 1, %s1413_s23 }
  0x42   : > { %p126_p3 = scmp.ne.s32.totalorder %s1413_s23, %s1409_s22  ;;  %p2013_p5 = scmp.lt.s32.totalorder %s1445_s7, 4 }
  0x43   : > { %s2106_s17 = smov (%p2052_p1, %s39_s17), 0  ;;  %p2054_p9 = scmp.eq.s32.totalorder %s1445_s7, 0 }
  0x44   : > { %2053 = sst [smem:[#allocation28_spill]] %s2106_s17  ;;  %s1628_s12 = ssub.s32 %s1437_s29, %s2106_s17 }
  0x45   : > { %p117_p7 = scmp.eq.s32.totalorder %s1628_s12, 0  ;;  %p128_p12 = por %p126_p3, %p2054_p9 }
  0x46   : > { %s285_s21 = sand.u32 1, %s1445_s7   ;;  %s287_s9 = sand.u32 1, %s1413_s23  }
  0x47   : > { %s1637_s14 = scalar_select %p117_p7, %s1413_s23, %s119_s5  }
  0x48   : > { %s1639_s19 = sshll.u32 %s287_s9, 4  ;;  %s2011_s15 = sshll.u32 %s1437_s29, 8 }
  0x49   : > { %2055 = sst [smem:[#allocation29_spill]] %s1637_s14  ;;  %s2056_s3 = sld [smem:[#allocation33_spill]] }
  0x4a   : > { %s289_s17 = scalar_lea.vmem [#allocation8], %s1639_s19  ;;  %p1654_p13 = pnand %p2013_p5, %p128_p12 }
  0x4b   : > { %s296_s6 = sshll.u32 %s289_s17, 4  ;;  %s1658_s9 = scalar_lea.sflag [#allocation9], %s285_s21  ;;  %s1650_s6 = int_to_ptr.vmem [resolvable:$true] %s296_s6 }
  0x4c   : > { %s2057_s5 = scalar_select %p1654_p13, 1, 0 }
  0x4d   : > { %p2022_p4 = pneg %p1654_p13 }
  0x4f   : > { %s1647_s1 = scalar_lea.hbm %s2056_s3, %s2011_s15  ;;  %s1170_s15 = scalar_lea.hbm %s2056_s3, 512 }
  0x50   : > { %s1165_s20 = scalar_lea.hbm %s1647_s1, 256  ;;  %p1171_p10 = scmp.lt.u32.totalorder %s1647_s1, %s2056_s3 }
  0x51   : > { %p1166_p0 = scmp.ne.s32.totalorder %s1647_s1, %s1165_s20  ;;  %p1172_p3 = scmp.lt.u32.totalorder %s1170_s15, %s1165_s20 }
  0x52   : > { %p1174_p9 = scmp.lt.u32.totalorder %s1165_s20, %s1647_s1 }
  0x53   : > { %p1168_p6 = pnand %p2022_p4, %p1166_p0  ;;  %p1173_p7 = por %p1172_p3, %p1171_p10 }
  0x55   : > { %p1169_p8 = pneg %p1168_p6  ;;  %p1175_p12 = por %p1174_p9, %p1173_p7 }
  0x57   : > { %p1176_p5 = pnand %p1175_p12, %p1169_p8 }
  0x59   : > { %1179 = shalt.err (!%p1176_p5)
}
  0x5a   : > { %s1180_s21 = scalar_lea.vmem %s1650_s6, 256  ;;  %s1448_s17 = smov [#allocation8]  }
  0x5b   : > { %p1181_p0 = scmp.ne.s32.totalorder %s1650_s6, %s1180_s21  ;;  %s1185_s24 = sshll.u32 %s1448_s17, 4  ;;  %s1186_s24 = int_to_ptr.vmem [resolvable:$false] %s1185_s24 }
  0x5c   : > { %s1187_s23 = scalar_lea.vmem %s1186_s24, 512  ;;  %p1188_p1 = scmp.lt.s32.totalorder %s1650_s6, %s1186_s24 }
  0x5d   : > { %p1183_p6 = pnand %p1181_p0, %p2022_p4  ;;  %p1189_p10 = scmp.lt.s32.totalorder %s1187_s23, %s1180_s21 }
  0x5f   : > { %p1184_p2 = pneg %p1183_p6  ;;  %p1190_p3 = por %p1189_p10, %p1188_p1 }
  0x61   : > { %p1191_p7 = pnand %p1190_p3, %p1184_p2 }
  0x63   : > { %1194 = shalt.err (!%p1191_p7)
}
  0x64   : > { %s2027_s14 = smov 128   ;;  %s2028_s15 = smov 8  }
  0x65   : > { %992 = dma.hbm_to_vmem [thread:$0]  (!%p1654_p13), %s1647_s1, 256, %s1650_s6, %s1658_s9, %s2027_s14, %s2027_s14, %s2028_s15  }
  0x66   : > { %s2058_s20 = sshll.u32 %s1437_s29, 8  ;;  %s310_s23 = scalar_lea.vmem [#allocation10], %s1639_s19 }
  0x67   : > { %s1695_s24 = scalar_lea.hbm %s1998_s4, %s2058_s20  ;;  %s317_s3 = sshll.u32 %s310_s23, 4  ;;  %s1721_s3 = int_to_ptr.vmem [resolvable:$true] %s317_s3 }
  0x68   : > { %s1451_s28 = smov [#allocation7]   ;;  %s2059_s2 = sld [smem:[#allocation32_spill]] }
  0x69   : > { %s248_s27 = sshll.u32 %s1451_s28, 4  ;;  %p2060_p1 = pneg %p1587_p11  ;;  %s249_s27 = int_to_ptr.vmem [resolvable:$true] %s248_s27 }
  0x6e   : > { %s1195_s10 = scalar_lea.hbm %s2059_s2, 1024 }
  0x6f   : > { %p1196_p2 = scmp.ne.s32.totalorder %s2059_s2, %s1195_s10  ;;  %p1202_p12 = scmp.lt.u32.totalorder %s1195_s10, %s2059_s2 }
  0x71   : > { %p1198_p8 = pnand %p1196_p2, %p2060_p1 }
  0x73   : > { %p1199_p9 = pneg %p1198_p8 }
  0x75   : > { %p1204_p0 = pnand %p1202_p12, %p1199_p9 }
  0x77   : > { %1207 = shalt.err (!%p1204_p0)
}
  0x78   : > { %s1208_s28 = scalar_lea.vmem %s249_s27, 1024  ;;  %p2061_p10 = pmov %p2060_p1 }
  0x79   : > { %p1209_p6 = scmp.ne.s32.totalorder %s249_s27, %s1208_s28  ;;  %p1216_p4 = scmp.lt.s32.totalorder %s249_s27, %s249_s27 }
  0x7a   : > { %p1217_p5 = scmp.lt.s32.totalorder %s1208_s28, %s1208_s28 }
  0x7b   : > { %p1211_p3 = pnand %p1209_p6, %p2061_p10 }
  0x7c   : > { %p1218_p13 = por %p1217_p5, %p1216_p4 }
  0x7d   : > { %p1212_p7 = pneg %p1211_p3 }
  0x7f   : > { %p1219_p1 = pnand %p1218_p13, %p1212_p7 }
  0x81   : > { %1222 = shalt.err (!%p1219_p1)
}
  0x82   : > { %s2025_s0 = smov 64   ;;  %s2026_s22 = smov 4  }
  0x83   : > { %985 = dma.hbm_to_vmem [thread:$0]  (!%p1587_p11), %s2059_s2, 1024, %s249_s27, [#allocation6], %s2025_s0, %s2025_s0, %s2026_s22  }
  0x84   : > { %s42_s13 = sadd.s32 1, %s1441_s30  ;;  %p2062_p13 = scmp.ne.s32.totalorder %s2050_s18, 0 }
  0x85   : > { %s51_s19 = sadd.s32 1, %s1425_s26  ;;  %p58_p4 = scmp.ne.s32.totalorder %s1425_s26, %s1421_s25 }
  0x86   : > { %s2108_s13 = smov (!%p2062_p13, %s42_s13), %s1441_s30  ;;  %s262_s20 = sand.u32 1, %s1425_s26  }
  0x87   : > { %p44_p5 = scmp.ge.s32.totalorder %s2108_s13, 2  ;;  %p2063_p2 = scmp.eq.s32.totalorder %s1445_s7, 0 }
  0x88   : > { %p2065_p9 = scmp.eq.s32.totalorder %s1554_s8, 3  ;;  %s881_s18 = sshll.u32 %s262_s20, 3 }
  0x89   : > { %p1733_p8 = por %p2063_p2, %p58_p4  ;;  %s2110_s13 = smov (%p44_p5, %s2108_s13), 0 }
  0x8a   : > { %p1739_p12 = por %p2065_p9, %p58_p4  ;;  %s882_s21 = sshll.u32 %s1437_s29, 1 }
  0x8b   : > { %s46_s17 = ssub.s32 %s1441_s30, %s2110_s13  ;;  %s883_s1 = sshll.u32 %s1441_s30, 2 }
  0x8c   : > { %s2066_s27 = scalar_select %p1739_p12, 1, 0 }
  0x8d   : > { %s48_s23 = sor.u32 %s1628_s12, %s46_s17  ;;  %s272_s6 = sadd.s32 %s883_s1, %s882_s21 }
  0x8e   : > { %p49_p11 = scmp.eq.s32.totalorder %s48_s23, 0  ;;  %s884_s28 = sshll.u32 %s272_s6, 6 }
  0x8f   : > { %s266_s10 = scalar_lea.vmem [#allocation2], %s881_s18  ;;  %s2067_s15 = sld [smem:[#allocation30_spill]] }
  0x90   : > { %s275_s11 = sshll.u32 %s266_s10, 4  ;;  %p2068_p0 = scmp.lt.s32.totalorder %s1445_s7, 4  ;;  %s1760_s11 = int_to_ptr.vmem [resolvable:$true] %s275_s11 }
  0x91   : > { %s1753_s0 = scalar_select %p49_p11, %s1425_s26, %s51_s19  }
  0x92   : > { %p1766_p6 = pnand %p2068_p0, %p1733_p8  ;;  %s1223_s21 = scalar_lea.hbm %s1695_s24, 256 }
  0x93   : > { %p1224_p10 = scmp.ne.s32.totalorder %s1695_s24, %s1223_s21  ;;  %p2070_p3 = scmp.ne.s32.totalorder %s2057_s5, 0 }
  0x94   : > { %s1228_s14 = scalar_lea.hbm %s1998_s4, 512  ;;  %p1229_p4 = scmp.lt.u32.totalorder %s1695_s24, %s1998_s4 }
  0x95   : > { %s1758_s2 = scalar_lea.hbm %s2067_s15, %s884_s28  ;;  %p2071_p7 = pneg %p2070_p3 }
  0x96   : > { %p1230_p5 = scmp.lt.u32.totalorder %s1228_s14, %s1223_s21  ;;  %p1232_p8 = scmp.lt.u32.totalorder %s1223_s21, %s1695_s24 }
  0x97   : > { %p1226_p1 = pnand %p1224_p10, %p2071_p7 }
  0x98   : > { %p1231_p2 = por %p1230_p5, %p1229_p4 }
  0x99   : > { %p1227_p13 = pneg %p1226_p1 }
  0x9a   : > { %p1233_p9 = por %p1232_p8, %p1231_p2 }
  0x9c   : > { %p1234_p11 = pnand %p1233_p9, %p1227_p13 }
  0x9e   : > { %1237 = shalt.err (!%p1234_p11)
}
  0x9f   : > { %s1238_s16 = scalar_lea.vmem %s1721_s3, 256  ;;  %p2072_p10 = pmov %p2071_p7 }
  0xa0   : > { %p1239_p0 = scmp.ne.s32.totalorder %s1721_s3, %s1238_s16  ;;  %s1454_s23 = smov [#allocation10]  }
  0xa1   : > { %s1243_s1 = sshll.u32 %s1454_s23, 4  ;;  %s1244_s1 = int_to_ptr.vmem [resolvable:$false] %s1243_s1 }
  0xa2   : > { %p1241_p7 = pnand %p1239_p0, %p2072_p10  ;;  %s1245_s6 = scalar_lea.vmem %s1244_s1, 512 }
  0xa3   : > { %p1246_p12 = scmp.lt.s32.totalorder %s1721_s3, %s1244_s1  ;;  %p1247_p4 = scmp.lt.s32.totalorder %s1245_s6, %s1238_s16 }
  0xa4   : > { %p1242_p1 = pneg %p1241_p7 }
  0xa5   : > { %p1248_p5 = por %p1247_p4, %p1246_p12 }
  0xa7   : > { %p1249_p2 = pnand %p1248_p5, %p1242_p1 }
  0xa9   : > { %1252 = shalt.err (!%p1249_p2)
}
  0xaa   : > { %s2073_s28 = smov 8   ;;  %s2074_s10 = smov 128  }
  0xab   : > { %995 = dma.hbm_to_vmem [thread:$0]  (!%p2070_p3), %s1695_s24, 256, %s1721_s3, %s1658_s9, %s2074_s10, %s2074_s10, %s2073_s28  }
  0xac   : > { %s1799_s21 = scalar_lea.sflag [#allocation3], %s262_s20  ;;  %s1253_s19 = scalar_lea.hbm %s1758_s2, 128 }
  0xad   : > { %p1254_p12 = scmp.ne.s32.totalorder %s1758_s2, %s1253_s19  ;;  %p1255_p13 = pneg %p1766_p6 }
  0xae   : > { %s1258_s14 = scalar_lea.hbm %s2067_s15, 512  ;;  %p1259_p11 = scmp.lt.u32.totalorder %s1758_s2, %s2067_s15 }
  0xaf   : > { %p1256_p8 = pnand %p1255_p13, %p1254_p12  ;;  %p1260_p3 = scmp.lt.u32.totalorder %s1258_s14, %s1253_s19 }
  0xb0   : > { %p1262_p10 = scmp.lt.u32.totalorder %s1253_s19, %s1758_s2 }
  0xb1   : > { %p1257_p9 = pneg %p1256_p8  ;;  %p1261_p0 = por %p1260_p3, %p1259_p11 }
  0xb3   : > { %p1263_p7 = por %p1262_p10, %p1261_p0 }
  0xb5   : > { %p1264_p1 = pnand %p1263_p7, %p1257_p9 }
  0xb7   : > { %1267 = shalt.err (!%p1264_p1)
}
  0xb8   : > { %s1268_s3 = scalar_lea.vmem %s1760_s11, 128  ;;  %s1455_s9 = smov [#allocation2]  }
  0xb9   : > { %p1269_p4 = scmp.ne.s32.totalorder %s1760_s11, %s1268_s3  ;;  %s1273_s24 = sshll.u32 %s1455_s9, 4  ;;  %s1274_s24 = int_to_ptr.vmem [resolvable:$false] %s1273_s24 }
  0xba   : > { %s1275_s20 = scalar_lea.vmem %s1274_s24, 256  ;;  %p1276_p12 = scmp.lt.s32.totalorder %s1760_s11, %s1274_s24 }
  0xbb   : > { %p1271_p5 = pnand %p1269_p4, %p1255_p13  ;;  %p1277_p8 = scmp.lt.s32.totalorder %s1275_s20, %s1268_s3 }
  0xbd   : > { %p1272_p2 = pneg %p1271_p5  ;;  %p1278_p11 = por %p1277_p8, %p1276_p12 }
  0xbf   : > { %p1279_p3 = pnand %p1278_p11, %p1272_p2 }
  0xc1   : > { %1282 = shalt.err (!%p1279_p3)
}
  0xc2   : > { %s2075_s16 = smov 4   ;;  %s2076_s23 = smov 64  }
  0xc3   : > { %989 = dma.hbm_to_vmem [thread:$0]  (!%p1766_p6), %s1758_s2, 128, %s1760_s11, %s1799_s21, %s2076_s23, %s2076_s23, %s2075_s16  }
  0xc4   : > { %s2077_s1 = sld [smem:[#allocation27_spill]] }
  0xca   : > { %p2078_p13 = scmp.ne.s32.totalorder %s2077_s1, 0 }
  0xcb   : > { %s2079_s6 = sld [smem:[#allocation24_spill]] (!%p2078_p13)  ;;  %s1833_s28 = sand.u32 (!%p2078_p13), 1, %s1421_s25  }
  0xcc   : > { %329 = sbr.rel (%p2078_p13) target bundleno = 898 (0x382), region = 40  ;;  %s1836_s10 = sshll.u32 (!%p2078_p13), %s1833_s28, 3 }
  0xcd   : > { %s332_s12 = scalar_lea.sflag (!%p2078_p13), [#allocation3], %s1833_s28  ;;  %s335_s19 = scalar_lea.vmem (!%p2078_p13), [#allocation2], %s1836_s10 }
  0xd1   : > { %p2080_p9 = scmp.ne.s32.totalorder (!%p2078_p13), %s2079_s6, 0 }
  0xd3   : > { %1384 = dma.done.wait (%p2080_p9), %s332_s12, 128  }
  0xd4   : > { %1386 = vsyncadd (%p2080_p9), %s332_s12, 4294967168  ;;  %p2081_p6 = scmp.eq.s32.totalorder %s1554_s8, 0 }
  0xd6   : > { %1388 = dma.done.wait (%p2081_p6), [#allocation6], 1040   ;;  %p2082_p0 = pmov %p2081_p6 }
  0xd7   : > { %s2083_s2 = sld [smem:[#allocation19_spill]]  ;;  %s348_s21 = sand.u32 1, %s1554_s8  }
  0xd8   : > { %1390 = vsyncadd (%p2082_p0), [#allocation6], 4294966256  ;;  %s2084_s11 = sld [smem:[#allocation25_spill]]  ;;  %s349_s14 = scalar_lea.sflag [#allocation9], %s348_s21 }
  0xdd   : > { %s350_s5 = sand.u32 1, %s2083_s2  }
  0xde   : > { %s1850_s18 = sshll.u32 %s350_s5, 4  ;;  %p2085_p10 = scmp.ne.s32.totalorder %s2084_s11, 0 }
  0xdf   : > { %s352_s22 = scalar_lea.vmem [#allocation8], %s1850_s18 }
  0xe0   : > { %1392 = dma.done.wait (%p2085_p10), %s349_s14, 512  }
  0xe1   : > { %1394 = vsyncadd (%p2085_p10), %s349_s14, 4294966784  ;;  %v1456_v0 = vmov 0.0   ;;  %v929_v1 = vld [vmem:[%s335_s19] sm:$0xff]   ;;  %v1125_v4 = vld [vmem:[#allocation7] sm:$0xff]   ;;  %vm1457_vm0 = vmmov 0   ;;  %s1458_s8 = smov 32  }
  0xe2   : > { %941 = vmatprep.subr.bf16.mxu0 %v1456_v0  ;;  %v930_v2 = vunpack.c.l.bf16 %v929_v1  ;;  %v931_v3 = vunpack.c.h.bf16 %v929_v1  ;;  %v1126_v5 = vld [vmem:[#allocation7 + $0x8] sm:$0xff]   ;;  %v1127_v8 = vld [vmem:[#allocation7 + $0x10] sm:$0xff]   ;;  %v1128_v9 = vld [vmem:[#allocation7 + $0x18] sm:$0xff]   ;;  %957 = vmatprep.mubr.msk.bf16.mxu0 %vm1457_vm0, %v1456_v0  ;;  %s361_s17 = scalar_lea.vmem [#allocation10], %s1850_s18  ;;  %s1459_s3 = smov 96   ;;  %vm615_vm1 = vcmask 130048  }
  0xe3   : > { %942 = vmatpush3.bf16.msra.mxu0 %v1125_v4  ;;  %v1129_v10 = vld [vmem:[#allocation7 + $0x20] sm:$0xff]   ;;  %v1130_v11 = vld [vmem:[#allocation7 + $0x28] sm:$0xff]   ;;  %v1131_v12 = vld [vmem:[#allocation7 + $0x30] sm:$0xff]   ;;  %s2086_s9 = sld [smem:[#allocation22_spill]]  ;;  %s2087_s24 = sld [smem:[#allocation23_spill]]  ;;  %vm618_vm2 = vcmask 261120  }
  0xe4   : > { %v415_v6 = vmul.f32 %v930_v2, %v930_v2  ;;  %943 = vmatprep.subr.bf16.mxu0 %v1456_v0  ;;  %v416_v7 = vmul.f32 %v931_v3, %v931_v3  ;;  %v1132_v13 = vld [vmem:[#allocation7 + $0x38] sm:$0xff]   ;;  %v545_v14 = vld [vmem:[%s352_s22] sm:$0xff]  ;;  %s1460_s20 = smov 16   ;;  %s1461_s16 = smov 64   ;;  %vm621_vm3 = vcmask 392192   ;;  %vm632_vm4 = vcmask 519168  }
  0xe5   : > { %575 = vrot.lane.b32.xlu1 %v545_v14, %s1458_s8  ;;  %v547_v15 = vld [vmem:[%s361_s17] sm:$0xff]  ;;  %v546_v16 = vld [vmem:[%s352_s22 + $0x8] sm:$0xff]  ;;  %s404_s12 = scalar_lea.vmem [#allocation12], %s1836_s10  ;;  %s1878_s11 = scalar_lea.vmem [#allocation11], %s1836_s10 }
  0xe6   : > { %417 = vadd.xlane.f32.xlu0 %v415_v6  ;;  %v548_v17 = vld [vmem:[%s361_s17 + $0x8] sm:$0xff]  ;;  %s688_s19 = sshll.u32 %s404_s12, 4  ;;  %s670_s21 = sshll.u32 %s1878_s11, 4  ;;  %s1875_s19 = int_to_ptr.vmem [resolvable:$true] %s688_s19  ;;  %s1897_s21 = int_to_ptr.vmem [resolvable:$true] %s670_s21 }
  0xe7   : > { %944 = vmatpush3.bf16.msra.mxu0 %v1126_v5  ;;  %v899_v27 = vld [vmem:[#allocation5] ss:$0 sm:$0xff]  ;;  %s2088_s14 = sld [smem:[#allocation35_spill]]  ;;  %s2089_s17 = sld [smem:[#allocation34_spill]] }
  0xe8   : > { %945 = vmatprep.subr.bf16.mxu0 %v1456_v0  ;;  %p2090_p1 = scmp.ne.s32.totalorder %s2066_s27, 0 }
  0xe9   : > { %577 = vrot.lane.b32.xlu1 %v546_v16, %s1458_s8  ;;  %s914_s23 = sshll.u32 %s2086_s9, 1  ;;  %s915_s1 = sshll.u32 %s2087_s24, 2 }
  0xea   : > { %419 = vadd.xlane.f32.xlu0 %v416_v7  ;;  %s1871_s6 = sadd.s32 %s915_s1, %s914_s23  ;;  %s655_s9 = scalar_lea.sflag [#allocation13], %s1833_s28 }
  0xeb   : > { %946 = vmatpush3.bf16.msra.mxu0 %v1127_v8  ;;  %s916_s2 = sshll.u32 %s1871_s6, 6  ;;  %s1283_s24 = scalar_lea.vmem %s1875_s19, 128 }
  0xec   : > { %947 = vmatprep.subr.bf16.mxu0 %v1456_v0  ;;  %p1284_p7 = scmp.ne.s32.totalorder %s1875_s19, %s1283_s24 }
  0xed   : > { %555 = vrot.lane.b32.xlu1 %v548_v17, %s1458_s8  ;;  %s1886_s22 = scalar_lea.hbm %s2088_s14, %s916_s2 }
  0xee   : > { %p1285_p4 = pnand %p1284_p7, %p2090_p1 }
  0xef   : > { %948 = vmatpush3.bf16.msra.mxu0 %v1128_v9 }
  0xf0   : > { %949 = vmatprep.subr.bf16.mxu0 %v1456_v0  ;;  %p1286_p5 = pneg %p1285_p4 }
  0xf3   : > { %950 = vmatpush3.bf16.msra.mxu0 %v1129_v10 }
  0xf4   : > { %951 = vmatprep.subr.bf16.mxu0 %v1456_v0 }
  0xf7   : > { %952 = vmatpush3.bf16.msra.mxu0 %v1130_v11 }
  0xf8   : > { %953 = vmatprep.subr.bf16.mxu0 %v1456_v0 }
  0xfb   : > { %954 = vmatpush3.bf16.msra.mxu0 %v1131_v12 }
  0xfc   : > { %955 = vmatprep.subr.bf16.mxu0 %v1456_v0 }
  0xff   : > { %956 = vmatpush3.bf16.msra.mxu0 %v1132_v13 }
 0x100   : > { %553 = vrot.lane.b32.xlu0 %v547_v15, %s1458_s8 }
 0x157   : > { %v576_v32 = vpop.permute.xlu1 %575 }
 0x15b   : > { %v578_v39 = vpop.permute.xlu1 %577 }
 0x15f   : > { %v556_v42 = vpop.permute.xlu1 %555 }
 0x173   : > { %v418_v18 = vpop.xlane.xlu0 %417 }
 0x174   : > { %v422_v19 = vmul.f32 0.0078125, %v418_v18 }
 0x176   : > { %v424_v20 = vadd.f32 1e-05, %v422_v19 }
 0x177   : > { %v420_v21 = vpop.xlane.xlu0 %419 }
 0x178   : > { %1133 = vrsqrt.f32 %v424_v20  ;;  %v423_v22 = vmul.f32 0.0078125, %v420_v21 }
 0x17a   : > { %v425_v23 = vadd.f32 1e-05, %v423_v22 }
 0x17b   : > { %v554_v36 = vpop.permute.xlu0 %553 }
 0x17c   : > { %1135 = vrsqrt.f32 %v425_v23 }
 0x182   : > { %v1134_v24 = vpop.eup %1133 }
 0x183   : > { %v428_v25 = vmul.f32 %v1134_v24, %v930_v2 }
 0x185   : > { %v437_v29 = vmul.f32 %v899_v27, %v428_v25 }
 0x186   : > { %v1136_v26 = vpop.eup %1135 }
 0x187   : > { %v429_v28 = vmul.f32 %v1136_v26, %v931_v3 }
 0x189   : > { %v438_v30 = vmul.f32 %v899_v27, %v429_v28 }
 0x18b   : > { %v439_v31 = vpack.c.bf16 %v438_v30, %v437_v29 }
 0x18d   : > { %958 = vmatmul.mubr.bf16.vlgmr.msra.gmra.mrb[0].mxu0 %v439_v31 }
 0x260   : > { %v538_v33 = vpop.f32.mrb[0].mxu0 }
 0x261   : > { %v959_v34 = vpop.f32.mrb[1].mxu0  ;;  %v581_v35 = vmul.f32 %v576_v32, %v538_v33  ;;  %v559_v40 = vmul.f32 %v554_v36, %v538_v33  ;;  %v571_v46 = vmul.f32 %v547_v15, %v538_v33  ;;  %v549_v51 = vmul.f32 %v545_v14, %v538_v33 }
 0x262   : > { %v541_v37 = vpop.f32.mrb[2].mxu0  ;;  %v926_v59 = vpack.c.bf16 %v538_v33, %v538_v33 }
 0x263   : > { %585 = vrot.lane.b32.xlu1 %v581_v35, %s1459_s3  ;;  %v960_v38 = vpop.f32.mrb[3].mxu0  ;;  %v582_v41 = vmul.f32 %v578_v39, %v541_v37  ;;  %v560_v43 = vmul.f32 %v556_v42, %v541_v37  ;;  %v572_v47 = vmul.f32 %v548_v17, %v541_v37  ;;  %v550_v53 = vmul.f32 %v546_v16, %v541_v37 }
 0x264   : > { %v927_v58 = vpack.c.bf16 %v541_v37, %v541_v37 }
 0x267   : > { %563 = vrot.lane.b32.xlu1 %v559_v40, %s1459_s3 }
 0x26b   : > { %587 = vrot.lane.b32.xlu1 %v582_v41, %s1459_s3 }
 0x26f   : > { %565 = vrot.lane.b32.xlu1 %v560_v43, %s1459_s3  ;;  %s1895_s3 = scalar_lea.hbm %s2089_s17, %s916_s2 }
 0x2d5   : > { %v586_v44 = vpop.permute.xlu1 %585 }
 0x2d6   : > { %v591_v49 = vadd.f32 %v586_v44, %v571_v46 }
 0x2d9   : > { %v564_v45 = vpop.permute.xlu1 %563 }
 0x2da   : > { %v569_v55 = vsub.f32 %v549_v51, %v564_v45 }
 0x2dd   : > { %v588_v48 = vpop.permute.xlu1 %587 }
 0x2de   : > { %v592_v50 = vadd.f32 %v588_v48, %v572_v47 }
 0x2e0   : > { %v1120_v52 = vpack.i.bf16 %v592_v50, %v591_v49 }
 0x2e1   : > { %v566_v54 = vpop.permute.xlu1 %565 }
 0x2e2   : > { %v570_v56 = vsub.f32 %v550_v53, %v566_v54  ;;  %1111 = vrot.lane.b32.xlu1 %v1120_v52, %s1460_s20 }
 0x2e4   : > { %v1115_v57 = vpack.i.bf16 %v570_v56, %v569_v55 }
 0x2e6   : > { %1121 = vrot.lane.b32.xlu1 %v1120_v52, %s1458_s8  ;;  %1116 = vrot.lane.b32.xlu0 %v1115_v57, %s1460_s20  ;;  %s1462_s20 = smov [#allocation12]  }
 0x2e7   : > { %s1287_s23 = sshll.u32 %s1462_s20, 4  ;;  %s1288_s23 = int_to_ptr.vmem [resolvable:$false] %s1287_s23 }
 0x2e8   : > { %s1289_s1 = scalar_lea.vmem %s1288_s23, 256  ;;  %p1290_p2 = scmp.lt.s32.totalorder %s1875_s19, %s1288_s23 }
 0x2e9   : > { %p1291_p12 = scmp.lt.s32.totalorder %s1289_s1, %s1283_s24 }
 0x2ea   : > { %643 = vrot.lane.b32.xlu1 %v927_v58, %s1461_s16  ;;  %641 = vrot.lane.b32.xlu0 %v926_v59, %s1461_s16 }
 0x2eb   : > { %p1292_p8 = por %p1291_p12, %p1290_p2 }
 0x2ed   : > { %p1293_p11 = pnand %p1292_p8, %p1286_p5 }
 0x354   : > { %v1112_v60 = vpop.permute.xlu1 %1111 }
 0x355   : > { %v1114_v61 = vunpack.i.h.bf16 %v1112_v60  ;;  %v1113_v62 = vunpack.i.l.bf16 %v1112_v60 }
 0x357   : > { %v617_v5 = vsel %vm615_vm1, %v570_v56, %v1114_v61  ;;  %v616_v6 = vsel %vm615_vm1, %v569_v55, %v1113_v62 }
 0x358   : > { %v1117_v63 = vpop.permute.xlu0 %1116  ;;  %v1122_v0 = vpop.permute.xlu1 %1121 }
 0x359   : > { %v1119_v1 = vunpack.i.h.bf16 %v1117_v63  ;;  %v1118_v2 = vunpack.i.l.bf16 %v1117_v63  ;;  %v1124_v3 = vunpack.i.h.bf16 %v1122_v0  ;;  %v1123_v4 = vunpack.i.l.bf16 %v1122_v0 }
 0x35b   : > { %v619_v7 = vsel %vm618_vm2, %v616_v6, %v1118_v2  ;;  %v620_v8 = vsel %vm618_vm2, %v617_v5, %v1119_v1 }
 0x35c   : > { %v622_v9 = vsel %vm621_vm3, %v619_v7, %v1123_v4  ;;  %v623_v10 = vsel %vm621_vm3, %v620_v8, %v1124_v3  ;;  %v642_v11 = vpop.permute.xlu0 %641  ;;  %v644_v12 = vpop.permute.xlu1 %643 }
 0x35d   : > { %v924_v13 = vpack.c.bf16 %v622_v9, %v622_v9  ;;  %v925_v14 = vpack.c.bf16 %v623_v10, %v623_v10  ;;  %647 = vst.msk [vmem:[%s404_s12] sm:$0xf] %vm632_vm4, %v642_v11  ;;  %648 = vst.msk [vmem:[%s404_s12 + $0x4] sm:$0xf] %vm632_vm4, %v644_v12 }
 0x35e   : > { %1296 = shalt.err (!%p1293_p11)
}
 0x35f   : > { %s1297_s6 = scalar_lea.hbm %s1886_s22, 128  ;;  %s1301_s5 = scalar_lea.hbm %s2088_s14, 512 }
 0x360   : > { %p1298_p3 = scmp.ne.s32.totalorder %s1886_s22, %s1297_s6  ;;  %p1302_p6 = scmp.lt.u32.totalorder %s1886_s22, %s2088_s14 }
 0x361   : > { %p1303_p0 = scmp.lt.u32.totalorder %s1301_s5, %s1297_s6  ;;  %p1305_p7 = scmp.lt.u32.totalorder %s1297_s6, %s1886_s22 }
 0x362   : > { %p1299_p13 = pnand %p1298_p3, %p2090_p1 }
 0x363   : > { %p1304_p10 = por %p1303_p0, %p1302_p6 }
 0x364   : > { %p1300_p9 = pneg %p1299_p13 }
 0x365   : > { %p1306_p4 = por %p1305_p7, %p1304_p10 }
 0x367   : > { %p1307_p5 = pnand %p1306_p4, %p1300_p9 }
 0x369   : > { %1310 = shalt.err (!%p1307_p5)
}
 0x36a   : > { %s1463_s8 = smov 4   ;;  %633 = vst.msk [vmem:[%s1878_s11] sm:$0xf] %vm632_vm4, %v924_v13  ;;  %634 = vst.msk [vmem:[%s1878_s11 + $0x4] sm:$0xf] %vm632_vm4, %v925_v14  ;;  %s650_s24 = scalar_lea.sflag [#allocation4], %s1833_s28 }
 0x36b   : > { %976 = dma.vmem_to_hbm [thread:$0]  (%p2090_p1), %s1875_s19, 128, %s1886_s22, %s655_s9, %s1461_s16, %s1461_s16, %s1463_s8  }
 0x36c   : > { %s1311_s20 = scalar_lea.vmem %s1897_s21, 128  ;;  %s1464_s23 = smov [#allocation11]  }
 0x36d   : > { %p1312_p2 = scmp.ne.s32.totalorder %s1897_s21, %s1311_s20  ;;  %s1315_s1 = sshll.u32 %s1464_s23, 4  ;;  %s1316_s1 = int_to_ptr.vmem [resolvable:$false] %s1315_s1 }
 0x36e   : > { %s1317_s6 = scalar_lea.vmem %s1316_s1, 256  ;;  %p1318_p11 = scmp.lt.s32.totalorder %s1897_s21, %s1316_s1 }
 0x36f   : > { %p1313_p12 = pnand %p1312_p2, %p2090_p1  ;;  %p1319_p3 = scmp.lt.s32.totalorder %s1317_s6, %s1311_s20 }
 0x371   : > { %p1314_p8 = pneg %p1313_p12  ;;  %p1320_p13 = por %p1319_p3, %p1318_p11 }
 0x373   : > { %p1321_p9 = pnand %p1320_p13, %p1314_p8 }
 0x375   : > { %1324 = shalt.err (!%p1321_p9)
}
 0x376   : > { %s1325_s19 = scalar_lea.hbm %s1895_s3, 128  ;;  %s1329_s9 = scalar_lea.hbm %s2089_s17, 512 }
 0x377   : > { %p1326_p6 = scmp.ne.s32.totalorder %s1895_s3, %s1325_s19  ;;  %p1330_p7 = scmp.lt.u32.totalorder %s1895_s3, %s2089_s17 }
 0x378   : > { %p1331_p4 = scmp.lt.u32.totalorder %s1329_s9, %s1325_s19  ;;  %p1333_p2 = scmp.lt.u32.totalorder %s1325_s19, %s1895_s3 }
 0x379   : > { %p1327_p0 = pnand %p1326_p6, %p2090_p1 }
 0x37a   : > { %p1332_p5 = por %p1331_p4, %p1330_p7 }
 0x37b   : > { %p1328_p10 = pneg %p1327_p0 }
 0x37c   : > { %p1334_p12 = por %p1333_p2, %p1332_p5 }
 0x37e   : > { %p1335_p8 = pnand %p1334_p12, %p1328_p10 }
 0x380   : > { %1338 = shalt.err (!%p1335_p8)
}
 0x381   : > { %975 = dma.vmem_to_hbm [thread:$0]  (%p2090_p1), %s1897_s21, 128, %s1895_s3, %s650_s24, %s1461_s16, %s1461_s16, %s1463_s8  }
 0x382 PF: > { %s2091_s5 = sld [smem:[#allocation21_spill]]  ;;  %s2092_s18 = sld [smem:[#allocation26_spill]] }
 0x383   : > { %p1008_p11 = scmp.ge.s32.totalorder %s1445_s7, 2 }
 0x388   : > { %s703_s10 = sand.u32 1, %s2091_s5   ;;  %p2093_p3 = scmp.ne.s32.totalorder %s2092_s18, 0 }
 0x389   : > { %s704_s20 = scalar_lea.sflag [#allocation4], %s703_s10 }
 0x38a   : > { %p997_p13 = pnand %p1008_p11, %p2093_p3 }
 0x38c   : > { %1396 = dma.done.wait (!%p997_p13), %s704_s20, 128  }
 0x38d   : > { %1398 = vsyncadd (!%p997_p13), %s704_s20, 4294967168  ;;  %s713_s27 = scalar_lea.sflag [#allocation13], %s703_s10 }
 0x38e   : > { %1400 = dma.done.wait (!%p997_p13), %s713_s27, 128  }
 0x38f   : > { %1402 = vsyncadd (!%p997_p13), %s713_s27, 4294967168  ;;  %s30_s7 = sadd.s32 1, %s1445_s7   ;;  %s2094_s21 = sld [smem:[#allocation19_spill]] }
 0x390   : > { %p27_p9 = scmp.ge.s32.totalorder %s30_s7, 6   ;;  %s2095_s22 = sld [smem:[#allocation20_spill]] }
 0x391   : > { %s2096_s23 = sld [smem:[#allocation29_spill]]  ;;  %s2097_s16 = sld [smem:[#allocation28_spill]] }
 0x392   : > { %s2098_s24 = smov %s1421_s25  ;;  %s2099_s25 = smov %s1425_s26 }
 0x393   : > { %s2100_s26 = smov %s1753_s0  ;;  %s2101_s27 = smov %s1437_s29 }
 0x394   : > { %s2102_s28 = smov %s1441_s30  ;;  %s2104_s30 = smov %s2110_s13 }
 0x395   :  { %29 = sbr.rel (!%p27_p9) target bundleno = 21 (0x15), region = 134 }
 0x397   : > { %s2103_s29 = smov %s2097_s16 }
 0x39c   :  { %718 = vsyncpa [#allocation3], 1 }
 0x39d   :  { %720 = vsyncpa [#allocation3 + $0x1], 1 }
 0x39e   :  { %721 = vsyncpa [#allocation6], 1 }
 0x39f   :  { %722 = vsyncpa [#allocation9], 1 }
 0x3a0   :  { %724 = vsyncpa [#allocation9 + $0x1], 1 }
 0x3a1   :  { %725 = vsyncpa [#allocation4], 1 }
 0x3a2   :  { %727 = vsyncpa [#allocation4 + $0x1], 1 }
 0x3a3   :  { %728 = vsyncpa [#allocation13], 1 }
 0x3a4   :  { %730 = vsyncpa [#allocation13 + $0x1], 1 }

</bundles_post_ra>
